<compile_context>
chip_gen: v7x
topology: tpu7x:2x2x1
jax: 0.10.0
libtpu: 0.0.40
codegen_flags: <defaults>
</compile_context>

<pallas_src>
import functools
import math

import jax
import jax.numpy as jnp
from jax.experimental import pallas as pl
from jax.experimental.pallas import tpu as pltpu


def _cdiv(a, b):
    return -(-a // b)


def _round_up(x, m):
    return ((x + m - 1) // m) * m


def _vmem_capacity_bytes():
    try:
        return int(pltpu.get_tpu_info().vmem_capacity_bytes)
    except Exception:
        return 64 * 1024 * 1024  # conservative fallback (v7x per-core VMEM)


def _default_act_dtype(compute_dtype):
    """bf16 bias-add + GELU only on chips with a bf16 VPU/EUP (v6e, v7x)."""
    if jnp.dtype(compute_dtype) != jnp.dtype(jnp.bfloat16):
        return jnp.float32
    try:
        kind = jax.devices()[0].device_kind.lower()
    except Exception:
        return jnp.float32
    if "v6" in kind or "v7" in kind or "7x" in kind:
        return jnp.bfloat16
    return jnp.float32


def _mlp_kernel(x_ref, w1_ref, b1_ref, w2_ref, b2_ref, o_ref, acc_ref, *,
                compute_dtype, act_dtype):
    """One (tile_m, in_f) row slab x one hidden-dim chunk of fc1->GELU->fc2."""
    k = pl.program_id(1)

    @pl.when(k == 0)
    def _init():
        acc_ref[...] = jnp.zeros_like(acc_ref)

    x = x_ref[...].astype(compute_dtype)  # in-kernel cast (no wrapper HBM pass)
    h = jnp.dot(x, w1_ref[...], preferred_element_type=jnp.float32)
    if jnp.dtype(act_dtype) != jnp.dtype(jnp.float32):
        h = h.astype(act_dtype)           # bf16 VALU/EUP path on v6e/v7x
    h = h + b1_ref[...].astype(h.dtype)
    # TODO(synk): PyTorch nn.GELU default is the exact erf form; the tanh
    # approximation is used here (EUP-friendly, |diff| < 1e-3).
    h = jax.nn.gelu(h, approximate=True)
    acc_ref[...] += jnp.dot(h.astype(w2_ref.dtype), w2_ref[...],
                            preferred_element_type=jnp.float32)

    @pl.when(k == pl.num_programs(1) - 1)
    def _finalize():
        o = acc_ref[...] + b2_ref[...].astype(jnp.float32)
        o_ref[...] = o.astype(o_ref.dtype)


def _plan_tiles(M, in_f, hid, out_f, x_bytes, comp_bytes, out_bytes,
                max_tile_m, vmem_budget):
    """Choose (tile_m, tile_h, n_k, estimated VMEM bytes)."""
    # ---- hidden-dim chunking: only when the full weights do not fit ----
    weight_budget = vmem_budget // 2
    full_w = (in_f * hid + hid * out_f) * comp_bytes + hid * 4  # single copy
    if full_w <= weight_budget:
        tile_h, n_k = hid, 1
        w_bytes = full_w                       # Buffered(1): one copy resident
    else:
        per_h = 2 * ((in_f + out_f) * comp_bytes + 4)  # double-buffered chunks
        tile_h = max(256, (weight_budget // per_h) // 256 * 256)
        tile_h = min(tile_h, _round_up(hid, 256))
        n_k = _cdiv(hid, tile_h)
        if n_k == 1:                           # degenerate: keep fully resident
            tile_h = hid
            w_bytes = full_w
        else:
            w_bytes = per_h * tile_h

    # ---- row tiling (per-row VMEM, including in-kernel temporaries) ----
    per_row = (2 * in_f * x_bytes              # x tile (double-buffered)
               + in_f * comp_bytes             # in-kernel compute-dtype x copy
               + tile_h * (4 + comp_bytes)     # f32 h + compute-dtype h
               + out_f * 4                     # f32 accumulator scratch
               + 2 * out_f * out_bytes)        # output tile (double-buffered)
    fixed = w_bytes + out_f * 4                # weights + b1 chunk + b2

    align = 256 if M >= 256 else (128 if M >= 128 else 16)
    tm = min(max_tile_m, _round_up(M, align))
    if M >= 2 * align:                         # >=2 row tiles -> both v7x TCs
        tm = min(tm, _round_up(_cdiv(M, 2), align))
    tm = max(align, (tm // align) * align)
    while tm > align and fixed + tm * per_row > vmem_budget:
        tm = max(align, ((tm // 2) // align) * align)
    return tm, tile_h, n_k, fixed + tm * per_row


def mlp_forward(x, w1, b1, w2, b2, *, max_tile_m=1024,
                compute_dtype=jnp.bfloat16, out_dtype=None):
    """x: (..., in_features) -> (..., out_features), matching Mlp.forward with
    drop=0.0 (dropout is identity).

    w1: (in_features, hidden), w2: (hidden, out_features) -- the transposes of
    PyTorch nn.Linear.weight, so y = x @ w + b.  Weights are held in
    `compute_dtype` (bf16 by default, f32 MXU accumulation); pass
    compute_dtype=jnp.float32 for full-precision weights, and out_dtype to
    override the output dtype (defaults to x.dtype).
    """
    in_f, hid = w1.shape
    hid2, out_f = w2.shape
    assert hid2 == hid and x.shape[-1] == in_f
    assert b1.shape == (hid,) and b2.shape == (out_f,)

    lead = x.shape[:-1]
    M = math.prod(lead) if lead else 1
    x2d = x.reshape(M, in_f)

    out_dtype = x.dtype if out_dtype is None else out_dtype
    x_bytes = jnp.dtype(x.dtype).itemsize
    comp_bytes = jnp.dtype(compute_dtype).itemsize
    out_bytes = jnp.dtype(out_dtype).itemsize
    act_dtype = _default_act_dtype(compute_dtype)

    vmem_cap = _vmem_capacity_bytes()
    vmem_budget = int(vmem_cap * 0.78)      # ~100 MiB v5e/v6e, ~50 MiB v7x
    tile_m, tile_h, n_k, vmem_need = _plan_tiles(
        M, in_f, hid, out_f, x_bytes, comp_bytes, out_bytes,
        max_tile_m, vmem_budget)

    # Pad rows only when unavoidable (common case: no extra pass over x).
    M_pad = _round_up(M, tile_m)
    if M_pad != M:
        x2d = jnp.pad(x2d, ((0, M_pad - M), (0, 0)))

    # Weights in compute dtype (halves their HBM/VMEM cost); biases stay f32.
    # x is NOT pre-cast -- the kernel casts its tile in VMEM.
    w1c = w1.astype(compute_dtype)
    w2c = w2.astype(compute_dtype)
    b1r = b1.reshape(1, hid).astype(jnp.float32)
    b2r = b2.reshape(1, out_f).astype(jnp.float32)

    hid_pad = tile_h * n_k
    if hid_pad != hid:
        # Zero-padding the hidden dim is exact: padded fc1 columns give
        # gelu(0)=0 rows which meet zero-padded fc2 rows.
        w1c = jnp.pad(w1c, ((0, 0), (0, hid_pad - hid)))
        b1r = jnp.pad(b1r, ((0, 0), (0, hid_pad - hid)))
        w2c = jnp.pad(w2c, ((0, hid_pad - hid), (0, 0)))

    if n_k == 1:
        # Grid-invariant operands: single-buffered, no pointless 2x VMEM.
        w1_spec = pl.BlockSpec((in_f, hid_pad), lambda i, k: (0, 0),
                               pipeline_mode=pl.Buffered(1))
        b1_spec = pl.BlockSpec((1, hid_pad), lambda i, k: (0, 0),
                               pipeline_mode=pl.Buffered(1))
        w2_spec = pl.BlockSpec((hid_pad, out_f), lambda i, k: (0, 0),
                               pipeline_mode=pl.Buffered(1))
    else:
        # Hidden-chunked fallback: default double-buffering to prefetch the
        # next weight chunk while the current one is on the MXU.
        w1_spec = pl.BlockSpec((in_f, tile_h), lambda i, k: (0, k))
        b1_spec = pl.BlockSpec((1, tile_h), lambda i, k: (0, k))
        w2_spec = pl.BlockSpec((tile_h, out_f), lambda i, k: (k, 0))
    b2_spec = pl.BlockSpec((1, out_f), lambda i, k: (0, 0),
                           pipeline_mode=pl.Buffered(1))

    grid = (M_pad // tile_m, n_k)
    kernel = functools.partial(_mlp_kernel, compute_dtype=compute_dtype,
                               act_dtype=act_dtype)
    vmem_limit = int(min(vmem_cap * 92 // 100,
                         max(vmem_need * 5 // 4 + (4 << 20), 32 << 20)))

    out2d = pl.pallas_call(
        kernel,
        out_shape=jax.ShapeDtypeStruct((M_pad, out_f), out_dtype),
        grid_spec=pltpu.PrefetchScalarGridSpec(
            num_scalar_prefetch=0,
            grid=grid,
            in_specs=[
                pl.BlockSpec((tile_m, in_f), lambda i, k: (i, 0)),  # x slab
                w1_spec, b1_spec, w2_spec, b2_spec,
            ],
            out_specs=pl.BlockSpec((tile_m, out_f), lambda i, k: (i, 0)),
            scratch_shapes=[pltpu.VMEM((tile_m, out_f), jnp.float32)],
        ),
        compiler_params=pltpu.CompilerParams(
            dimension_semantics=("parallel", "arbitrary"),
            vmem_limit_bytes=vmem_limit,
        ),
    )(x2d, w1c, b1r, w2c, b2r)

    if M_pad != M:
        out2d = out2d[:M]
    return out2d.reshape(*lead, out_f)


if __name__ == "__main__":
    key = jax.random.PRNGKey(0)
    kx, k1, k2, k3, k4 = jax.random.split(key, 5)

    # Small but lane-dense shapes (feature dims are multiples of 128).
    batch, seq = 2, 8
    in_features, hidden_features, out_features = 128, 256, 128

    x = jax.random.normal(kx, (batch, seq, in_features), dtype=jnp.float32)
    w1 = jax.random.normal(k1, (in_features, hidden_features),
                           dtype=jnp.float32) / math.sqrt(in_features)
    b1 = jax.random.normal(k2, (hidden_features,), dtype=jnp.float32) * 0.1
    w2 = jax.random.normal(k3, (hidden_features, out_features),
                           dtype=jnp.float32) / math.sqrt(hidden_features)
    b2 = jax.random.normal(k4, (out_features,), dtype=jnp.float32) * 0.1

    out = mlp_forward(x, w1, b1, w2, b2)
    out = jax.block_until_ready(out)
    assert out.shape == (batch, seq, out_features)
    assert out.dtype == x.dtype

    # Reference on the same bf16-quantized operands, with the same activation
    # dtype the kernel picked (kernel accumulates f32 on the MXU).
    act_dt = _default_act_dtype(jnp.bfloat16)
    xb = x.astype(jnp.bfloat16).astype(jnp.float32)
    w1b = w1.astype(jnp.bfloat16).astype(jnp.float32)
    w2b = w2.astype(jnp.bfloat16).astype(jnp.float32)
    h = (xb @ w1b).astype(act_dt)
    h = h + b1.astype(act_dt)
    h = jax.nn.gelu(h, approximate=True)
    h = h.astype(jnp.bfloat16).astype(jnp.float32)
    ref = h @ w2b + b2

    max_err = float(jnp.max(jnp.abs(out.astype(jnp.float32) - ref)))
    assert jnp.allclose(out.astype(jnp.float32), ref,
                        atol=5e-2, rtol=5e-2), max_err

    print("KERNEL_OK")
</pallas_src>

<mosaic_0001>
module attributes {stable_mosaic.version = 11 : i64} {
  func.func @_mlp_kernel(%arg0: i32, %arg1: i32, %arg2: memref<16x128xf32, #tpu.memory_space<vmem>>, %arg3: memref<128x256xbf16, #tpu.memory_space<vmem>>, %arg4: memref<1x256xf32, #tpu.memory_space<vmem>>, %arg5: memref<256x128xbf16, #tpu.memory_space<vmem>>, %arg6: memref<1x128xf32, #tpu.memory_space<vmem>>, %arg7: memref<16x128xf32, #tpu.memory_space<vmem>>, %arg8: memref<16x128xf32, #tpu.memory_space<vmem>>) attributes {dimension_semantics = [#tpu.dimension_semantics<parallel>, #tpu.dimension_semantics<arbitrary>], iteration_bounds = array<i64: 1, 1>, scalar_prefetch = 0 : i64, scratch_operands = 1 : i64, tpu.core_type = #tpu.core_type<tc>, window_params = [{transform_indices = @transform_0, window_bounds = array<i64: 16, 128>}, {pipeline_mode = #tpu.pipeline_mode<synchronous>, transform_indices = @transform_1, window_bounds = array<i64: 128, 256>}, {pipeline_mode = #tpu.pipeline_mode<synchronous>, transform_indices = @transform_2, window_bounds = array<i64: 1, 256>}, {pipeline_mode = #tpu.pipeline_mode<synchronous>, transform_indices = @transform_3, window_bounds = array<i64: 256, 128>}, {pipeline_mode = #tpu.pipeline_mode<synchronous>, transform_indices = @transform_4, window_bounds = array<i64: 1, 128>}, {transform_indices = @transform_5, window_bounds = array<i64: 16, 128>}]} {
    %c0_i32 = arith.constant 0 : i32
    %0 = arith.cmpi eq, %arg1, %c0_i32 : i32
    %1 = arith.extui %0 : i1 to i32
    %c0_i32_0 = arith.constant 0 : i32
    %2 = arith.cmpi ne, %1, %c0_i32_0 : i32
    scf.if %2 {
      %cst_19 = arith.constant 0.000000e+00 : f32
      %32 = vector.broadcast %cst_19 : f32 to vector<16x128xf32>
      %c0_20 = arith.constant 0 : index
      %c0_21 = arith.constant 0 : index
      %33 = vector.load %arg8[%c0_20, %c0_21] : memref<16x128xf32, #tpu.memory_space<vmem>>, vector<16x128xf32>
      tpu.vector_store %arg8[%c0_20, %c0_21], %32 {strides = array<i32>} : memref<16x128xf32, #tpu.memory_space<vmem>>, vector<16x128xf32>,
    } else {
    }
    %c0 = arith.constant 0 : index
    %c0_1 = arith.constant 0 : index
    %3 = vector.load %arg2[%c0, %c0_1] : memref<16x128xf32, #tpu.memory_space<vmem>>, vector<16x128xf32>
    %4 = arith.truncf %3 : vector<16x128xf32> to vector<16x128xbf16>
    %c0_2 = arith.constant 0 : index
    %c0_3 = arith.constant 0 : index
    %5 = vector.load %arg3[%c0_2, %c0_3] : memref<128x256xbf16, #tpu.memory_space<vmem>>, vector<128x256xbf16>
    %cst = arith.constant dense<0.000000e+00> : vector<16x256xf32>
    %6 = tpu.matmul %4, %5, %cst {dimension_numbers = #tpu.dot_dimension_numbers<[1], [0], [0], [1], [0, 0, 1, 1], [], []>} : vector<16x128xbf16>, vector<128x256xbf16>, vector<16x256xf32> -> vector<16x256xf32>
    %c0_4 = arith.constant 0 : index
    %c0_5 = arith.constant 0 : index
    %7 = vector.load %arg4[%c0_4, %c0_5] : memref<1x256xf32, #tpu.memory_space<vmem>>, vector<1x256xf32>
    %8 = vector.broadcast %7 : vector<1x256xf32> to vector<16x256xf32>
    %9 = arith.addf %6, %8 : vector<16x256xf32>
    %10 = arith.mulf %9, %9 : vector<16x256xf32>
    %11 = arith.mulf %9, %10 : vector<16x256xf32>
    %cst_6 = arith.constant 4.471500e-02 : f32
    %12 = vector.broadcast %cst_6 : f32 to vector<16x256xf32>
    %13 = arith.mulf %12, %11 : vector<16x256xf32>
    %14 = arith.addf %9, %13 : vector<16x256xf32>
    %cst_7 = arith.constant 0.797884583 : f32
    %15 = vector.broadcast %cst_7 : f32 to vector<16x256xf32>
    %16 = arith.mulf %15, %14 : vector<16x256xf32>
    %17 = math.tanh %16 : vector<16x256xf32>
    %cst_8 = arith.constant 1.000000e+00 : f32
    %18 = vector.broadcast %cst_8 : f32 to vector<16x256xf32>
    %19 = arith.addf %18, %17 : vector<16x256xf32>
    %cst_9 = arith.constant 5.000000e-01 : f32
    %20 = vector.broadcast %cst_9 : f32 to vector<16x256xf32>
    %21 = arith.mulf %20, %19 : vector<16x256xf32>
    %22 = arith.mulf %9, %21 : vector<16x256xf32>
    %c0_10 = arith.constant 0 : index
    %c0_11 = arith.constant 0 : index
    %23 = vector.load %arg8[%c0_10, %c0_11] : memref<16x128xf32, #tpu.memory_space<vmem>>, vector<16x128xf32>
    %24 = arith.truncf %22 : vector<16x256xf32> to vector<16x256xbf16>
    %c0_12 = arith.constant 0 : index
    %c0_13 = arith.constant 0 : index
    %25 = vector.load %arg5[%c0_12, %c0_13] : memref<256x128xbf16, #tpu.memory_space<vmem>>, vector<256x128xbf16>
    %cst_14 = arith.constant dense<0.000000e+00> : vector<16x128xf32>
    %26 = tpu.matmul %24, %25, %cst_14 {dimension_numbers = #tpu.dot_dimension_numbers<[1], [0], [0], [1], [0, 0, 1, 1], [], []>} : vector<16x256xbf16>, vector<256x128xbf16>, vector<16x128xf32> -> vector<16x128xf32>
    %27 = arith.addf %23, %26 : vector<16x128xf32>
    %c0_15 = arith.constant 0 : index
    %c0_16 = arith.constant 0 : index
    %28 = vector.load %arg8[%c0_15, %c0_16] : memref<16x128xf32, #tpu.memory_space<vmem>>, vector<16x128xf32>
    tpu.vector_store %arg8[%c0_15, %c0_16], %27 {strides = array<i32>} : memref<16x128xf32, #tpu.memory_space<vmem>>, vector<16x128xf32>,
    %c0_i32_17 = arith.constant 0 : i32
    %29 = arith.cmpi eq, %arg1, %c0_i32_17 : i32
    %30 = arith.extui %29 : i1 to i32
    %c0_i32_18 = arith.constant 0 : i32
    %31 = arith.cmpi ne, %30, %c0_i32_18 : i32
    scf.if %31 {
      %c0_19 = arith.constant 0 : index
      %c0_20 = arith.constant 0 : index
      %32 = vector.load %arg8[%c0_19, %c0_20] : memref<16x128xf32, #tpu.memory_space<vmem>>, vector<16x128xf32>
      %c0_21 = arith.constant 0 : index
      %c0_22 = arith.constant 0 : index
      %33 = vector.load %arg6[%c0_21, %c0_22] : memref<1x128xf32, #tpu.memory_space<vmem>>, vector<1x128xf32>
      %34 = vector.broadcast %33 : vector<1x128xf32> to vector<16x128xf32>
      %35 = arith.addf %32, %34 : vector<16x128xf32>
      %c0_23 = arith.constant 0 : index
      %c0_24 = arith.constant 0 : index
      %36 = vector.load %arg7[%c0_23, %c0_24] : memref<16x128xf32, #tpu.memory_space<vmem>>, vector<16x128xf32>
      tpu.vector_store %arg7[%c0_23, %c0_24], %35 {strides = array<i32>} : memref<16x128xf32, #tpu.memory_space<vmem>>, vector<16x128xf32>,
    } else {
    }
    return
  }
  func.func @transform_0(%arg0: i32, %arg1: i32) -> (i32, i32) {
    %c0_i32 = arith.constant 0 : i32
    %c0_i32_0 = arith.constant 0 : i32
    return %arg0, %c0_i32 : i32, i32
  }
  func.func @transform_1(%arg0: i32, %arg1: i32) -> (i32, i32) {
    %c0_i32 = arith.constant 0 : i32
    %c0_i32_0 = arith.constant 0 : i32
    %c0_i32_1 = arith.constant 0 : i32
    return %c0_i32, %c0_i32_0 : i32, i32
  }
  func.func @transform_2(%arg0: i32, %arg1: i32) -> (i32, i32) {
    %c0_i32 = arith.constant 0 : i32
    %c0_i32_0 = arith.constant 0 : i32
    %c0_i32_1 = arith.constant 0 : i32
    return %c0_i32, %c0_i32_0 : i32, i32
  }
  func.func @transform_3(%arg0: i32, %arg1: i32) -> (i32, i32) {
    %c0_i32 = arith.constant 0 : i32
    %c0_i32_0 = arith.constant 0 : i32
    %c0_i32_1 = arith.constant 0 : i32
    return %c0_i32, %c0_i32_0 : i32, i32
  }
  func.func @transform_4(%arg0: i32, %arg1: i32) -> (i32, i32) {
    %c0_i32 = arith.constant 0 : i32
    %c0_i32_0 = arith.constant 0 : i32
    %c0_i32_1 = arith.constant 0 : i32
    return %c0_i32, %c0_i32_0 : i32, i32
  }
  func.func @transform_5(%arg0: i32, %arg1: i32) -> (i32, i32) {
    %c0_i32 = arith.constant 0 : i32
    %c0_i32_0 = arith.constant 0 : i32
    return %arg0, %c0_i32 : i32, i32
  }
}

</mosaic_0001>

<bundles_post_ra>
// kernel: tpu_custom_call.1
= control target key start
LH: loop header
LB: loop body
LE: loop exit
PB: predicated region body
PF: predicated region fallthrough
CT: control target
= control target key end

     0   :  { %10 = vsyncpa [#allocation4], 0  ;;  %s785_s0 = inlined_call_operand.hbm [shape: f32[16,128], index: 0, kind: input, shape index: {}]   ;;  %s786_s1 = inlined_call_operand.hbm [shape: bf16[128,256], index: 1, kind: input, shape index: {}]   ;;  %s787_s2 = inlined_call_operand.vmem [shape: f32[1,256], index: 2, kind: input, shape index: {}]   ;;  %s788_s3 = inlined_call_operand.hbm [shape: bf16[256,128], index: 3, kind: input, shape index: {}]   ;;  %s789_s4 = inlined_call_operand.vmem [shape: f32[1,128], index: 4, kind: input, shape index: {}]   ;;  %s790_s5 = inlined_call_operand.hbm [shape: f32[16,128], index: 5, kind: output, shape index: {}]  }
   0x1   :  { %11 = vsyncpa [#allocation7], 0 }
   0x2   :  { %12 = vsyncpa [#allocation5], 0  ;;  %s676_s18 = smov [#allocation6]   ;;  %s677_s20 = smov [#allocation3]  }
   0x3   :  { %s30_s19 = sshll.u32 %s676_s18, 4  ;;  %s18_s21 = sshll.u32 %s677_s20, 4  ;;  %s31_s19 = int_to_ptr.vmem [resolvable:$true] %s30_s19  ;;  %s715_s21 = int_to_ptr.vmem [resolvable:$true] %s18_s21 }
   0x4   :  { %s582_s24 = scalar_lea.hbm %s786_s1, 2048 }
   0x5   :  { %p583_p0 = scmp.ne.s32.totalorder %s786_s1, %s582_s24  ;;  %p586_p1 = scmp.lt.u32.totalorder %s582_s24, %s786_s1 }
   0x7   :  { %p588_p2 = pnand %p586_p1, %p583_p0 }
   0x9   :  { %591 = shalt.err (!%p588_p2)
}
   0xa   :  { %s592_s29 = scalar_lea.vmem %s31_s19, 2048  ;;  %p597_p4 = scmp.lt.s32.totalorder %s31_s19, %s31_s19 }
   0xb   :  { %p593_p3 = scmp.ne.s32.totalorder %s31_s19, %s592_s29  ;;  %p598_p5 = scmp.lt.s32.totalorder %s592_s29, %s592_s29 }
   0xd   :  { %p599_p6 = por %p598_p5, %p597_p4 }
   0xf   :  { %p600_p7 = pnand %p599_p6, %p593_p3 }
  0x11   :  { %603 = shalt.err (!%p600_p7)
}
  0x12   :  { %s678_s30 = smov 128   ;;  %s679_s6 = smov 8  }
  0x13   :  { %36 = dma.hbm_to_vmem [thread:$0]  %s786_s1, 2048, %s31_s19, [#allocation7], %s678_s30, %s678_s30, %s679_s6  }
  0x14   :  { %s604_s11 = scalar_lea.hbm %s785_s0, 256 }
  0x15   :  { %p605_p8 = scmp.ne.s32.totalorder %s785_s0, %s604_s11  ;;  %p608_p9 = scmp.lt.u32.totalorder %s604_s11, %s785_s0 }
  0x17   :  { %p610_p10 = pnand %p608_p9, %p605_p8 }
  0x19   :  { %613 = shalt.err (!%p610_p10)
}
  0x1a   :  { %s614_s16 = scalar_lea.vmem %s715_s21, 256  ;;  %p619_p12 = scmp.lt.s32.totalorder %s715_s21, %s715_s21 }
  0x1b   :  { %p615_p11 = scmp.ne.s32.totalorder %s715_s21, %s614_s16  ;;  %p620_p13 = scmp.lt.s32.totalorder %s614_s16, %s614_s16 }
  0x1d   :  { %p621_p0 = por %p620_p13, %p619_p12 }
  0x1f   :  { %p622_p1 = pnand %p621_p0, %p615_p11 }
  0x21   :  { %625 = shalt.err (!%p622_p1)
}
  0x22   :  { %24 = dma.hbm_to_vmem [thread:$0]  %s785_s0, 256, %s715_s21, [#allocation4], %s678_s30, %s678_s30, %s679_s6  }
  0x23   :  { %s680_s18 = smov [#allocation8]   ;;  %s626_s23 = scalar_lea.hbm %s788_s3, 2048 }
  0x24   :  { %s44_s19 = sshll.u32 %s680_s18, 4  ;;  %p627_p2 = scmp.ne.s32.totalorder %s788_s3, %s626_s23  ;;  %s45_s19 = int_to_ptr.vmem [resolvable:$true] %s44_s19 }
  0x25   :  { %p630_p3 = scmp.lt.u32.totalorder %s626_s23, %s788_s3 }
  0x27   :  { %p632_p4 = pnand %p630_p3, %p627_p2 }
  0x29   :  { %635 = shalt.err (!%p632_p4)
}
  0x2a   :  { %s636_s28 = scalar_lea.vmem %s45_s19, 2048  ;;  %p641_p6 = scmp.lt.s32.totalorder %s45_s19, %s45_s19 }
  0x2b   :  { %p637_p5 = scmp.ne.s32.totalorder %s45_s19, %s636_s28  ;;  %p642_p7 = scmp.lt.s32.totalorder %s636_s28, %s636_s28 }
  0x2d   :  { %p643_p8 = por %p642_p7, %p641_p6 }
  0x2f   :  { %p644_p9 = pnand %p643_p8, %p637_p5 }
  0x31   :  { %647 = shalt.err (!%p644_p9)
}
  0x32   :  { %s681_s0 = smov 64   ;;  %s682_s21 = smov 4  }
  0x33   :  { %50 = dma.hbm_to_vmem [thread:$0]  %s788_s3, 2048, %s45_s19, [#allocation7], %s681_s0, %s681_s0, %s682_s21  }
  0x34   :  { %670 = dma.done.wait [#allocation4], 256  }
  0x35   :  { %671 = vsyncadd [#allocation4], 4294967040 }
  0x36   :  { %672 = dma.done.wait [#allocation7], 4096  }
  0x37   :  { %673 = vsyncadd [#allocation7], 4294963200  ;;  %v683_v0 = vmov 0   ;;  %v534_v1 = vld [vmem:[#allocation6 + $0x4] ss:$8 sps:$4 sm:$0xff]   ;;  %v69_v17 = vld [vmem:[#allocation3] sm:$0xff]  ;;  %v90_v36 = vlaneseq }
  0x38   :  { %212 = vmatprep.mubr.bf16.mxu0 %v683_v0  ;;  %v536_v2 = vld [vmem:[#allocation6] ss:$8 sps:$4 sm:$0xff]   ;;  %180 = vmatprep.subr.bf16.mxu0 %v534_v1  ;;  %v537_v3 = vld [vmem:[#allocation6 + $0x14] ss:$8 sps:$4 sm:$0xff]   ;;  %v539_v4 = vld [vmem:[#allocation6 + $0x10] ss:$8 sps:$4 sm:$0xff]  }
  0x39   :  { %181 = vmatpush1.bf16.msra.mxu0 %v536_v2  ;;  %v540_v5 = vld [vmem:[#allocation6 + $0x24] ss:$8 sps:$4 sm:$0xff]   ;;  %v542_v6 = vld [vmem:[#allocation6 + $0x20] ss:$8 sps:$4 sm:$0xff]   ;;  %v543_v7 = vld [vmem:[#allocation6 + $0x34] ss:$8 sps:$4 sm:$0xff]  }
  0x3a   :  { %182 = vmatprep.subr.bf16.mxu0 %v537_v3  ;;  %v545_v8 = vld [vmem:[#allocation6 + $0x30] ss:$8 sps:$4 sm:$0xff]   ;;  %v546_v9 = vld [vmem:[#allocation6 + $0x44] ss:$8 sps:$4 sm:$0xff]   ;;  %v548_v10 = vld [vmem:[#allocation6 + $0x40] ss:$8 sps:$4 sm:$0xff]  }
  0x3b   :  { %v549_v11 = vld [vmem:[#allocation6 + $0x54] ss:$8 sps:$4 sm:$0xff]   ;;  %v551_v12 = vld [vmem:[#allocation6 + $0x50] ss:$8 sps:$4 sm:$0xff]   ;;  %v552_v13 = vld [vmem:[#allocation6 + $0x64] ss:$8 sps:$4 sm:$0xff]  }
  0x3c   :  { %v554_v14 = vld [vmem:[#allocation6 + $0x60] ss:$8 sps:$4 sm:$0xff]   ;;  %v555_v15 = vld [vmem:[#allocation6 + $0x74] ss:$8 sps:$4 sm:$0xff]   ;;  %v557_v16 = vld [vmem:[#allocation6 + $0x70] ss:$8 sps:$4 sm:$0xff]  }
  0x3d   :  { %183 = vmatpush1.bf16.msra.mxu0 %v539_v4  ;;  %v70_v18 = vld [vmem:[#allocation3 + $0x8] sm:$0xff]  ;;  %v558_v20 = vld [vmem:[#allocation8 + $0x40] sm:$0xff]   ;;  %v560_v22 = vld [vmem:[#allocation8 + $0x48] sm:$0xff]   ;;  %v91_v37 = vshrl.u32 %v90_v36, 7  ;;  %s684_s10 = smov [#allocation9]  }
  0x3e   :  { %184 = vmatprep.subr.bf16.mxu0 %v540_v5  ;;  %v71_v19 = vpack.c.bf16 %v70_v18, %v69_v17  ;;  %v559_v21 = vld [vmem:[#allocation8] sm:$0xff]   ;;  %503 = vmatprep.subr.bf16.mxu1 %v558_v20  ;;  %v561_v23 = vld [vmem:[#allocation8 + $0x8] sm:$0xff]   ;;  %v562_v24 = vld [vmem:[#allocation8 + $0x50] sm:$0xff]   ;;  %s457_s11 = sshll.u32 %s684_s10, 4  ;;  %s458_s11 = int_to_ptr.vmem [resolvable:$true] %s457_s11 }
  0x3f   :  { %504 = vmatpush3.bf16.msra.mxu1 %v559_v21  ;;  %v563_v25 = vld [vmem:[#allocation8 + $0x10] sm:$0xff]   ;;  %v564_v26 = vld [vmem:[#allocation8 + $0x58] sm:$0xff]   ;;  %v566_v28 = vld [vmem:[#allocation8 + $0x60] sm:$0xff]   ;;  %v92_v38 = vsub.s32 0, %v91_v37  ;;  %v96_v40 = vsub.s32 1, %v91_v37  ;;  %s648_s12 = scalar_lea.vmem %s458_s11, 256  ;;  %p653_p11 = scmp.lt.s32.totalorder %s458_s11, %s458_s11 }
  0x40   :  { %505 = vmatprep.subr.bf16.mxu1 %v560_v22  ;;  %v565_v27 = vld [vmem:[#allocation8 + $0x18] sm:$0xff]   ;;  %v567_v29 = vld [vmem:[#allocation8 + $0x20] sm:$0xff]   ;;  %v568_v30 = vld [vmem:[#allocation8 + $0x68] sm:$0xff]   ;;  %p649_p10 = scmp.ne.s32.totalorder %s458_s11, %s648_s12  ;;  %p654_p12 = scmp.lt.s32.totalorder %s648_s12, %s648_s12 }
  0x41   :  { %185 = vmatpush1.bf16.msra.mxu0 %v542_v6  ;;  %v569_v31 = vld [vmem:[#allocation8 + $0x28] sm:$0xff]   ;;  %v570_v32 = vld [vmem:[#allocation8 + $0x70] sm:$0xff]   ;;  %v572_v34 = vld [vmem:[#allocation8 + $0x78] sm:$0xff]  }
  0x42   :  { %186 = vmatprep.subr.bf16.mxu0 %v543_v7  ;;  %v571_v33 = vld [vmem:[#allocation8 + $0x30] sm:$0xff]   ;;  %v573_v35 = vld [vmem:[#allocation8 + $0x38] sm:$0xff]   ;;  %p655_p13 = por %p654_p12, %p653_p11 }
  0x43   :  { %506 = vmatpush3.bf16.msra.mxu1 %v561_v23  ;;  %v88_v39 = vld [vmem:[%s787_s2] sm:$0x3] }
  0x44   :  { %507 = vmatprep.subr.bf16.mxu1 %v562_v24  ;;  %v93_v41 = vrot.slane %v88_v39, %v92_v38  ;;  %v97_v42 = vrot.slane %v88_v39, %v96_v40  ;;  %p656_p0 = pnand %p655_p13, %p649_p10 }
  0x45   :  { %187 = vmatpush1.bf16.msra.mxu0 %v545_v8 }
  0x46   :  { %188 = vmatprep.subr.bf16.mxu0 %v546_v9 }
  0x47   :  { %508 = vmatpush3.bf16.msra.mxu1 %v563_v25 }
  0x48   :  { %509 = vmatprep.subr.bf16.mxu1 %v564_v26 }
  0x49   :  { %189 = vmatpush1.bf16.msra.mxu0 %v548_v10 }
  0x4a   :  { %190 = vmatprep.subr.bf16.mxu0 %v549_v11 }
  0x4b   :  { %510 = vmatpush3.bf16.msra.mxu1 %v565_v27  ;;  %v502_v27 = vld [vmem:[%s789_s4] ss:$0 sm:$0xff] }
  0x4c   :  { %511 = vmatprep.subr.bf16.mxu1 %v566_v28 }
  0x4d   :  { %191 = vmatpush1.bf16.msra.mxu0 %v551_v12 }
  0x4e   :  { %192 = vmatprep.subr.bf16.mxu0 %v552_v13 }
  0x4f   :  { %512 = vmatpush3.bf16.msra.mxu1 %v567_v29 }
  0x50   :  { %513 = vmatprep.subr.bf16.mxu1 %v568_v30 }
  0x51   :  { %193 = vmatpush1.bf16.msra.mxu0 %v554_v14 }
  0x52   :  { %194 = vmatprep.subr.bf16.mxu0 %v555_v15 }
  0x53   :  { %514 = vmatpush3.bf16.msra.mxu1 %v569_v31 }
  0x54   :  { %515 = vmatprep.subr.bf16.mxu1 %v570_v32 }
  0x55   :  { %195 = vmatpush1.bf16.msra.mxu0 %v557_v16 }
  0x57   :  { %516 = vmatpush3.bf16.msra.mxu1 %v571_v33 }
  0x58   :  { %213 = vmatmul.mubr.bf16.vlgmr.msra.gmra.mrb[0].mxu0 %v71_v19  ;;  %517 = vmatprep.subr.bf16.mxu1 %v572_v34 }
  0x5b   :  { %518 = vmatpush3.bf16.msra.mxu1 %v573_v35 }
 0x12b   :  { %v214_v43 = vpop.f32.mrb[0].mxu0 }
 0x12c   :  { %v215_v44 = vadd.f32 %v214_v43, %v93_v41  ;;  %v216_v45 = vpop.f32.mrb[1].mxu0 }
 0x12d   :  { %v217_v46 = vadd.f32 %v216_v45, %v97_v42  ;;  %v218_v47 = vpop.f32.mrb[2].mxu0 }
 0x12e   :  { %v223_v48 = vmul.f32 %v215_v44, %v215_v44  ;;  %v219_v49 = vadd.f32 %v218_v47, %v93_v41  ;;  %v220_v50 = vpop.f32.mrb[3].mxu0 }
 0x12f   :  { %v224_v51 = vmul.f32 %v217_v46, %v217_v46  ;;  %v221_v52 = vadd.f32 %v220_v50, %v97_v42 }
 0x130   :  { %v227_v53 = vmul.f32 %v223_v48, %v215_v44  ;;  %v225_v54 = vmul.f32 %v219_v49, %v219_v49 }
 0x131   :  { %v228_v55 = vmul.f32 %v224_v51, %v217_v46  ;;  %v226_v56 = vmul.f32 %v221_v52, %v221_v52 }
 0x132   :  { %v231_v57 = vmul.f32 0.044715, %v227_v53  ;;  %v229_v58 = vmul.f32 %v225_v54, %v219_v49 }
 0x133   :  { %v232_v59 = vmul.f32 0.044715, %v228_v55  ;;  %v230_v60 = vmul.f32 %v226_v56, %v221_v52 }
 0x134   :  { %v235_v61 = vadd.f32 %v231_v57, %v215_v44  ;;  %v233_v62 = vmul.f32 0.044715, %v229_v58 }
 0x135   :  { %v234_v63 = vmul.f32 0.044715, %v230_v60  ;;  %v236_v0 = vadd.f32 %v232_v59, %v217_v46 }
 0x136   :  { %v239_v1 = vmul.f32 0.7978846, %v235_v61  ;;  %v237_v2 = vadd.f32 %v233_v62, %v219_v49 }
 0x137   :  { %v238_v3 = vadd.f32 %v234_v63, %v221_v52  ;;  %v240_v4 = vmul.f32 0.7978846, %v236_v0 }
 0x138   :  { %574 = vtanh.f32 %v239_v1  ;;  %v241_v5 = vmul.f32 0.7978846, %v237_v2 }
 0x139   :  { %v242_v6 = vmul.f32 0.7978846, %v238_v3  ;;  %576 = vtanh.f32 %v240_v4 }
 0x13a   :  { %578 = vtanh.f32 %v241_v5 }
 0x13b   :  { %580 = vtanh.f32 %v242_v6 }
 0x142   :  { %v575_v7 = vpop.eup %574 }
 0x143   :  { %v577_v8 = vpop.eup %576  ;;  %v247_v9 = vadd.f32 1.0, %v575_v7 }
 0x144   :  { %v579_v10 = vpop.eup %578  ;;  %v248_v11 = vadd.f32 1.0, %v577_v8 }
 0x145   :  { %v581_v12 = vpop.eup %580  ;;  %v249_v13 = vadd.f32 1.0, %v579_v10  ;;  %v251_v14 = vmul.f32 0.5, %v247_v9 }
 0x146   :  { %v250_v15 = vadd.f32 1.0, %v581_v12  ;;  %v252_v16 = vmul.f32 0.5, %v248_v11 }
 0x147   :  { %v253_v17 = vmul.f32 0.5, %v249_v13  ;;  %v255_v19 = vmul.f32 %v251_v14, %v215_v44 }
 0x148   :  { %v254_v18 = vmul.f32 0.5, %v250_v15  ;;  %v256_v21 = vmul.f32 %v252_v16, %v217_v46 }
 0x149   :  { %v257_v20 = vmul.f32 %v253_v17, %v219_v49 }
 0x14a   :  { %v258_v22 = vmul.f32 %v254_v18, %v221_v52 }
 0x14b   :  { %v261_v23 = vpack.c.bf16 %v257_v20, %v255_v19 }
 0x14c   :  { %v262_v24 = vpack.c.bf16 %v258_v22, %v256_v21 }
 0x14e   :  { %423 = vmatprep.mubr.bf16.mxu1 %v262_v24 }
 0x14f   :  { %424 = vmatmul.mubr.bf16.vlgmr.msra.gmra.mrb[0].mxu1 %v261_v23 }
 0x222   :  { %v519_v25 = vpop.f32.mrb[0].mxu1 }
 0x223   :  { %v520_v26 = vpop.f32.mrb[1].mxu1 }
 0x224   :  { %v521_v28 = vadd.f32 %v520_v26, %v519_v25  ;;  %v522_v29 = vpop.f32.mrb[2].mxu1 }
 0x225   :  { %v523_v30 = vpop.f32.mrb[3].mxu1 }
 0x226   :  { %v448_v31 = vadd.f32 %v521_v28, %v502_v27  ;;  %v524_v32 = vadd.f32 %v523_v30, %v522_v29 }
 0x228   :  { %450 = vst [vmem:[#allocation9] sm:$0xff] %v448_v31  ;;  %v449_v33 = vadd.f32 %v524_v32, %v502_v27 }
 0x22a   :  { %451 = vst [vmem:[#allocation9 + $0x8] sm:$0xff] %v449_v33 }
 0x22b   :  { %659 = shalt.err (!%p656_p0)
}
 0x22c   :  { %s660_s14 = scalar_lea.hbm %s790_s5, 256 }
 0x22d   :  { %p661_p1 = scmp.ne.s32.totalorder %s790_s5, %s660_s14  ;;  %p664_p2 = scmp.lt.u32.totalorder %s660_s14, %s790_s5 }
 0x22f   :  { %p666_p3 = pnand %p664_p2, %p661_p1 }
 0x231   :  { %669 = shalt.err (!%p666_p3)
}
 0x232   :  { %463 = dma.vmem_to_hbm [thread:$0]  %s458_s11, 256, %s790_s5, [#allocation5], %s678_s30, %s678_s30, %s679_s6  }
 0x233   :  { %674 = dma.done.wait [#allocation5], 256  }
 0x234   :  { %675 = vsyncadd [#allocation5], 4294967040 }
 0x235   :  { %467 = vsyncpa [#allocation4], 1 }
 0x236   :  { %468 = vsyncpa [#allocation7], 1 }
 0x237   :  { %469 = vsyncpa [#allocation5], 1 }

</bundles_post_ra>
